<compile_context>
chip_gen: v6e
topology: v6e:2x2x1
jax: 0.10.0
libtpu: 0.0.40
codegen_flags: <defaults>
</compile_context>

<pallas_src>
import jax
import jax.numpy as jnp
from jax.experimental import pallas as pl
from jax.experimental.pallas import tpu as pltpu

LN_EPS = 1e-5                          # torch.nn.LayerNorm default
_TARGET_W_TILE_BYTES = 4 * 1024 * 1024  # ~4 MiB of weight bytes per grid step


def _round_up(x: int, m: int) -> int:
    return (x + m - 1) // m * m


def _cdiv(a: int, b: int) -> int:
    return -(-a // b)


def layernorm_kernel(x_ref, gamma_ref, beta_ref, o_ref):
    """LayerNorm over the hidden dim of a (TB, D) CLS tile.

    f32 math; output cast to the projection compute dtype (e.g. bf16) so the
    downstream MXU sees matched operands.
    """
    x = x_ref[...].astype(jnp.float32)
    mean = jnp.mean(x, axis=-1, keepdims=True)
    centered = x - mean
    var = jnp.mean(centered * centered, axis=-1, keepdims=True)
    xn = centered * jax.lax.rsqrt(var + LN_EPS)
    xn = xn * gamma_ref[...].astype(jnp.float32) \
         + beta_ref[...].astype(jnp.float32)
    o_ref[...] = xn.astype(o_ref.dtype)


def projection_kernel(xn_ref, w_ref, b_ref, o_ref):
    """(TB, D) @ (D, TN) + (1, TN).  Pure DMA + MXU steady state; both grid
    axes are independent ("parallel", "parallel")."""
    acc = jnp.dot(xn_ref[...], w_ref[...], preferred_element_type=jnp.float32)
    o_ref[...] = (acc + b_ref[...].astype(jnp.float32)).astype(o_ref.dtype)


def unembed_forward(h, gamma, beta, w_t, b, *, block_p=None):
    """Pallas implementation of Unembed.forward.

    h:     (B, S, D) hidden states
    gamma: (D,)      final_norm.weight
    beta:  (D,)      final_norm.bias
    w_t:   (D, P)    projection weight, transposed ONCE at init from the torch
                     (P, D) layout.  Ship it in bf16 for the fast HBM-bound
                     path (f32 also works).
    b:     (P,)      projection bias
    block_p:         optional weight-tile-width override (multiple of 128, or
                     >= P); default auto-sized from D / dtype / VMEM.
    returns (B, P) in h.dtype
    """
    if h.ndim != 3:
        raise ValueError(f"Hidden state dimension != 3, got {h.ndim}")
    B, S, D = h.shape
    if w_t.shape[0] != D:
        raise ValueError(f"Weight hidden dim {w_t.shape[0]} != {D}")
    P = w_t.shape[1]

    compute_dtype = w_t.dtype            # MXU operand dtype (bf16 recommended)
    itemsize = w_t.dtype.itemsize
    out_dtype = h.dtype

    # --- B tiling: minimal number of B tiles (each one re-streams the full
    #     weight), rounded to the sublane packing of the compute dtype. ---
    sub = max(8, 32 // itemsize)                    # f32 -> 8, bf16 -> 16
    n_btiles = _cdiv(B, 256)
    TB = _round_up(_cdiv(B, n_btiles), sub)
    B_pad = TB * n_btiles

    # --- P tiling: ~4 MiB of weight bytes per tile (lane multiple, capped at
    #     2048) so the double-buffered tile sits comfortably inside v7x's
    #     64 MiB VMEM while amortizing the ~0.35 us per-grid-step overhead.
    #     The weight is never padded: the last tile may be ragged; garbage
    #     columns only feed output columns >= P, which the masked store
    #     discards (the wrapper never returns them). ---
    if block_p is None:
        TN = (_TARGET_W_TILE_BYTES // (D * itemsize)) // 128 * 128
        TN = max(128, min(2048, TN))
        if _round_up(P, 128) <= TN:
            TN = P                                  # single full-width tile
    else:
        TN = block_p
    n_ptiles = _cdiv(P, TN)

    # --- CLS token; pad only the tiny (B, D) slice, never the weight. ---
    cls = h[:, 0, :]
    # TODO(synk): the CLS slice could be fused into the LN kernel with a
    # pl.Squeezed() seq dim in the BlockSpec; left to XLA (tiny strided read).
    if B_pad != B:
        cls = jnp.pad(cls, ((0, B_pad - B), (0, 0)))

    gamma2 = gamma.reshape(1, D)
    beta2 = beta.reshape(1, D)
    b2 = b.reshape(1, P)

    # --- Kernel 1: LayerNorm on the CLS slice (one-shot, tiny). ---
    xn = pl.pallas_call(
        layernorm_kernel,
        out_shape=jax.ShapeDtypeStruct((B_pad, D), compute_dtype),
        grid_spec=pltpu.PrefetchScalarGridSpec(
            num_scalar_prefetch=0,
            grid=(n_btiles,),
            in_specs=[
                pl.BlockSpec((TB, D), lambda i: (i, 0)),     # CLS tile
                pl.BlockSpec((1, D), lambda i: (0, 0)),      # gamma
                pl.BlockSpec((1, D), lambda i: (0, 0)),      # beta
            ],
            out_specs=pl.BlockSpec((TB, D), lambda i: (i, 0)),
        ),
        compiler_params=pltpu.CompilerParams(
            dimension_semantics=("parallel",),
        ),
    )(cls, gamma2, beta2)

    # --- Kernel 2: projection.  Both axes parallel -> megacore (v7x) can
    #     split the dominant weight stream across TensorCores. ---
    cost = pl.CostEstimate(
        flops=2 * B_pad * D * P,
        transcendentals=0,
        bytes_accessed=(D * P * itemsize            # dominant: weight stream
                        + B_pad * D * itemsize      # normalized activations
                        + B_pad * P * out_dtype.itemsize
                        + P * b.dtype.itemsize),
    )
    out = pl.pallas_call(
        projection_kernel,
        out_shape=jax.ShapeDtypeStruct((B_pad, P), out_dtype),
        grid_spec=pltpu.PrefetchScalarGridSpec(
            num_scalar_prefetch=0,
            grid=(n_btiles, n_ptiles),
            in_specs=[
                pl.BlockSpec((TB, D), lambda i, j: (i, 0)),   # normalized CLS
                # Weight tile: if profiling on v7x shows exposed DMA at tile
                # boundaries, sweep pipeline_mode=pl.Buffered(3) here.
                pl.BlockSpec((D, TN), lambda i, j: (0, j)),
                pl.BlockSpec((1, TN), lambda i, j: (0, j)),   # bias tile
            ],
            out_specs=pl.BlockSpec((TB, TN), lambda i, j: (i, j)),
        ),
        compiler_params=pltpu.CompilerParams(
            dimension_semantics=("parallel", "parallel"),
            # Sized for the double-buffered ~4-8 MiB weight tiles above;
            # leaves headroom under v7x's 64 MiB physical VMEM and lifts the
            # small default scoped limit on v5e/v6e.
            vmem_limit_bytes=48 * 1024 * 1024,
        ),
        cost_estimate=cost,
    )(xn, w_t, b2)

    return out[:B] if B_pad != B else out


def unembed_reference(h, gamma, beta, w_t, b):
    """Pure-JAX reference for correctness checking (f32 math)."""
    x = h[:, 0, :].astype(jnp.float32)
    mean = jnp.mean(x, axis=-1, keepdims=True)
    var = jnp.mean((x - mean) ** 2, axis=-1, keepdims=True)
    xn = (x - mean) * jax.lax.rsqrt(var + LN_EPS)
    xn = xn * gamma + beta
    return (xn @ w_t.astype(jnp.float32) + b).astype(h.dtype)


def _make_inputs(key, B, S, D, P, dtype=jnp.float32):
    k_h, k_g, k_b, k_w, k_pb = jax.random.split(key, 5)
    h = jax.random.normal(k_h, (B, S, D), dtype=jnp.float32)
    gamma = 1.0 + 0.01 * jax.random.normal(k_g, (D,), dtype=jnp.float32)
    beta = 0.01 * jax.random.normal(k_b, (D,), dtype=jnp.float32)
    # torch projection weight is (P, D); stored transposed once as (D, P).
    w_t = (jax.random.normal(k_w, (D, P), dtype=jnp.float32)
           / jnp.sqrt(D)).astype(dtype)
    b = 0.01 * jax.random.normal(k_pb, (P,), dtype=jnp.float32)
    return h, gamma, beta, w_t, b


if __name__ == "__main__":
    key = jax.random.PRNGKey(0)
    k1, k2 = jax.random.split(key)

    # Test 1: small shapes matching the module's forward (batch=2, seq=8,
    # hidden=32, proj_dim=16), f32 weights -> single-tile grid.
    B, S, D, P = 2, 8, 32, 16
    h, gamma, beta, w_t, b = _make_inputs(k1, B, S, D, P, dtype=jnp.float32)
    out = jax.block_until_ready(unembed_forward(h, gamma, beta, w_t, b))
    ref = unembed_reference(h, gamma, beta, w_t, b)
    assert out.shape == (B, P)
    assert jnp.allclose(out, ref, atol=1e-4, rtol=1e-4)

    # Test 2: bf16 weights + forced multi-tile, ragged last P tile
    # (P=640 with 256-wide tiles) -> exercises the no-pad weight path and the
    # fully-parallel 2D grid.
    B, S, D, P = 4, 8, 256, 640
    h, gamma, beta, w_t, b = _make_inputs(k2, B, S, D, P, dtype=jnp.bfloat16)
    out = jax.block_until_ready(
        unembed_forward(h, gamma, beta, w_t, b, block_p=256))
    ref = unembed_reference(h, gamma, beta, w_t, b)
    assert out.shape == (B, P)
    # bf16 operands -> looser tolerance vs the f32 reference (expected
    # precision loss, not a bug).
    assert jnp.allclose(out, ref, atol=5e-2, rtol=5e-2)

    print("KERNEL_OK")
</pallas_src>

<mosaic_0001>
module attributes {stable_mosaic.version = 11 : i64} {
  func.func @layernorm_kernel(%arg0: i32, %arg1: memref<8x32xf32, #tpu.memory_space<vmem>>, %arg2: memref<1x32xf32, #tpu.memory_space<vmem>>, %arg3: memref<1x32xf32, #tpu.memory_space<vmem>>, %arg4: memref<8x32xf32, #tpu.memory_space<vmem>>) attributes {dimension_semantics = [#tpu.dimension_semantics<parallel>], iteration_bounds = array<i64: 1>, scalar_prefetch = 0 : i64, scratch_operands = 0 : i64, tpu.core_type = #tpu.core_type<tc>, window_params = [{transform_indices = @transform_0, window_bounds = array<i64: 8, 32>}, {pipeline_mode = #tpu.pipeline_mode<synchronous>, transform_indices = @transform_1, window_bounds = array<i64: 1, 32>}, {pipeline_mode = #tpu.pipeline_mode<synchronous>, transform_indices = @transform_2, window_bounds = array<i64: 1, 32>}, {transform_indices = @transform_3, window_bounds = array<i64: 8, 32>}]} {
    %c0 = arith.constant 0 : index
    %c0_0 = arith.constant 0 : index
    %0 = vector.load %arg1[%c0, %c0_0] : memref<8x32xf32, #tpu.memory_space<vmem>>, vector<8x32xf32>
    %cst = arith.constant dense<0.000000e+00> : vector<8xf32>
    %1 = vector.multi_reduction <add>, %0, %cst [1] : vector<8x32xf32> to vector<8xf32>
    %2 = vector.shape_cast %1 : vector<8xf32> to vector<8x1xf32>
    %cst_1 = arith.constant 3.200000e+01 : f32
    %3 = vector.broadcast %cst_1 : f32 to vector<8x1xf32>
    %4 = arith.divf %2, %3 : vector<8x1xf32>
    %5 = vector.broadcast %4 : vector<8x1xf32> to vector<8x32xf32>
    %6 = arith.subf %0, %5 : vector<8x32xf32>
    %7 = arith.mulf %6, %6 : vector<8x32xf32>
    %cst_2 = arith.constant dense<0.000000e+00> : vector<8xf32>
    %8 = vector.multi_reduction <add>, %7, %cst_2 [1] : vector<8x32xf32> to vector<8xf32>
    %9 = vector.shape_cast %8 : vector<8xf32> to vector<8x1xf32>
    %cst_3 = arith.constant 3.200000e+01 : f32
    %10 = vector.broadcast %cst_3 : f32 to vector<8x1xf32>
    %11 = arith.divf %9, %10 : vector<8x1xf32>
    %cst_4 = arith.constant 9.99999974E-6 : f32
    %12 = vector.broadcast %cst_4 : f32 to vector<8x1xf32>
    %13 = arith.addf %11, %12 : vector<8x1xf32>
    %14 = math.rsqrt %13 : vector<8x1xf32>
    %15 = vector.broadcast %14 : vector<8x1xf32> to vector<8x32xf32>
    %16 = arith.mulf %6, %15 : vector<8x32xf32>
    %c0_5 = arith.constant 0 : index
    %c0_6 = arith.constant 0 : index
    %17 = vector.load %arg2[%c0_5, %c0_6] : memref<1x32xf32, #tpu.memory_space<vmem>>, vector<1x32xf32>
    %18 = vector.broadcast %17 : vector<1x32xf32> to vector<8x32xf32>
    %19 = arith.mulf %16, %18 : vector<8x32xf32>
    %c0_7 = arith.constant 0 : index
    %c0_8 = arith.constant 0 : index
    %20 = vector.load %arg3[%c0_7, %c0_8] : memref<1x32xf32, #tpu.memory_space<vmem>>, vector<1x32xf32>
    %21 = vector.broadcast %20 : vector<1x32xf32> to vector<8x32xf32>
    %22 = arith.addf %19, %21 : vector<8x32xf32>
    %c0_9 = arith.constant 0 : index
    %c0_10 = arith.constant 0 : index
    %23 = vector.load %arg4[%c0_9, %c0_10] : memref<8x32xf32, #tpu.memory_space<vmem>>, vector<8x32xf32>
    tpu.vector_store %arg4[%c0_9, %c0_10], %22 {strides = array<i32>} : memref<8x32xf32, #tpu.memory_space<vmem>>, vector<8x32xf32>,
    return
  }
  func.func @transform_0(%arg0: i32) -> (i32, i32) {
    %c0_i32 = arith.constant 0 : i32
    %c0_i32_0 = arith.constant 0 : i32
    return %arg0, %c0_i32 : i32, i32
  }
  func.func @transform_1(%arg0: i32) -> (i32, i32) {
    %c0_i32 = arith.constant 0 : i32
    %c0_i32_0 = arith.constant 0 : i32
    %c0_i32_1 = arith.constant 0 : i32
    return %c0_i32, %c0_i32_0 : i32, i32
  }
  func.func @transform_2(%arg0: i32) -> (i32, i32) {
    %c0_i32 = arith.constant 0 : i32
    %c0_i32_0 = arith.constant 0 : i32
    %c0_i32_1 = arith.constant 0 : i32
    return %c0_i32, %c0_i32_0 : i32, i32
  }
  func.func @transform_3(%arg0: i32) -> (i32, i32) {
    %c0_i32 = arith.constant 0 : i32
    %c0_i32_0 = arith.constant 0 : i32
    return %arg0, %c0_i32 : i32, i32
  }
}

</mosaic_0001>

<bundles_post_ra>
// kernel: tpu_custom_call.1
= control target key start
LH: loop header
LB: loop body
LE: loop exit
PB: predicated region body
PF: predicated region fallthrough
CT: control target
= control target key end

     0   :  { %8 = vsyncpa [#allocation3], 0  ;;  %s162_s0 = inlined_call_operand.hbm [shape: f32[8,32], index: 0, kind: input, shape index: {}]   ;;  %s163_s1 = inlined_call_operand.vmem [shape: f32[1,32], index: 1, kind: input, shape index: {}]   ;;  %s164_s2 = inlined_call_operand.vmem [shape: f32[1,32], index: 2, kind: input, shape index: {}]   ;;  %s165_s3 = inlined_call_operand.hbm [shape: f32[8,32], index: 3, kind: output, shape index: {}]  }
   0x1   :  { %9 = vsyncpa [#allocation4], 0  ;;  %s125_s12 = smov [#allocation2]  }
   0x2   :  { %s16_s13 = sshll.u32 %s125_s12, 4  ;;  %s17_s13 = int_to_ptr.vmem [resolvable:$true] %s16_s13 }
   0x3   :  { %s89_s14 = scalar_lea.vmem %s17_s13, 128  ;;  %p94_p1 = scmp.lt.s32.totalorder %s17_s13, %s17_s13 }
   0x4   :  { %p90_p0 = scmp.ne.s32.totalorder %s17_s13, %s89_s14  ;;  %p95_p2 = scmp.lt.s32.totalorder %s89_s14, %s89_s14 }
   0x6   :  { %p96_p3 = por %p95_p2, %p94_p1 }
   0x8   :  { %p97_p4 = pnand %p96_p3, %p90_p0 }
   0xa   :  { %100 = shalt.err (!%p97_p4)
}
   0xb   :  { %19 = dma.hbm_to_vmem [thread:$0]  %s162_s0, 128, %s17_s13, [#allocation3]  }
   0xc   :  { %121 = dma.done.wait [#allocation3], 128  }
   0xd   :  { %122 = vsyncadd [#allocation3], 4294967168  ;;  %vm28_vm0 = vcmask 261120   ;;  %v27_v0 = vld [vmem:[#allocation2] sm:$0xff]  ;;  %s126_s20 = smov [#allocation5]  }
   0xe   :  { %v29_v1 = vsel %vm28_vm0, %v27_v0, 0.0  ;;  %v75_v11 = vld [vmem:[%s163_s1] ss:$0 sm:$0xff]  ;;  %s66_s21 = sshll.u32 %s126_s20, 4  ;;  %s67_s21 = int_to_ptr.vmem [resolvable:$true] %s66_s21 }
   0xf   :  { %30 = vadd.xlane.f32.xlu0 %v29_v1  ;;  %v76_v13 = vld [vmem:[%s164_s2] ss:$0 sm:$0xff]  ;;  %s101_s22 = scalar_lea.vmem %s67_s21, 128  ;;  %p106_p6 = scmp.lt.s32.totalorder %s67_s21, %s67_s21 }
  0x10   :  { %p102_p5 = scmp.ne.s32.totalorder %s67_s21, %s101_s22  ;;  %p107_p7 = scmp.lt.s32.totalorder %s101_s22, %s101_s22 }
  0x12   :  { %p108_p8 = por %p107_p7, %p106_p6 }
  0x14   :  { %p109_p9 = pnand %p108_p8, %p102_p5 }
  0x98   :  { %v31_v2 = vpop.xlane.xlu0 %30 }
  0x99   :  { %v33_v3 = vmul.f32 0.03125, %v31_v2 }
  0x9b   :  { %v34_v4 = vsub.f32 %v27_v0, %v33_v3 }
  0x9d   :  { %v35_v5 = vmul.f32 %v34_v4, %v34_v4 }
  0x9f   :  { %v36_v6 = vsel %vm28_vm0, %v35_v5, 0.0 }
  0xa0   :  { %37 = vadd.xlane.f32.xlu0 %v36_v6 }
 0x129   :  { %v38_v7 = vpop.xlane.xlu0 %37 }
 0x12a   :  { %v39_v8 = vmul.f32 0.03125, %v38_v7 }
 0x12c   :  { %v40_v9 = vadd.f32 1e-05, %v39_v8 }
 0x12e   :  { %79 = vrsqrt.f32 %v40_v9 }
 0x13b   :  { %v80_v10 = vpop.eup %79 }
 0x13c   :  { %v42_v12 = vmul.f32 %v80_v10, %v34_v4 }
 0x13e   :  { %v50_v14 = vmul.f32 %v75_v11, %v42_v12 }
 0x140   :  { %v58_v15 = vadd.f32 %v76_v13, %v50_v14 }
 0x142   :  { %59 = vst.msk [vmem:[#allocation5] sm:$0xff] %vm28_vm0, %v58_v15 }
 0x143   :  { %112 = shalt.err (!%p109_p9)
}
 0x144   :  { %69 = dma.vmem_to_hbm [thread:$0]  %s67_s21, 128, %s165_s3, [#allocation4]  }
 0x145   :  { %123 = dma.done.wait [#allocation4], 128  }
 0x146   :  { %124 = vsyncadd [#allocation4], 4294967168 }
 0x147   :  { %73 = vsyncpa [#allocation3], 1 }
 0x148   :  { %74 = vsyncpa [#allocation4], 1 }

</bundles_post_ra>
